<compile_context>
chip_gen: v6e
topology: v6e:2x2x1
jax: 0.10.0
libtpu: 0.0.40
codegen_flags: <defaults>
</compile_context>

<pallas_src>
import numpy as np
import jax
import jax.numpy as jnp
from jax.experimental import pallas as pl
from jax.experimental.pallas import tpu as pltpu

H_IN, W_IN = 7, 7
H_OUT, W_OUT = 13, 13
N_IN = H_IN * W_IN        # 49
N_OUT = H_OUT * W_OUT     # 169


def _build_gather_matrix() -> np.ndarray:
    """Static (49, 169) multiplicity matrix G.

    G[i, p] = how many times input flat-index i contributes to output flat
    position p (used for both the value sum and the nonzero count).
    """
    base = np.array([[1, 0], [3, 0], [5, 0], [7, 0], [9, 0], [11, 0],
                     [0, 2], [2, 2], [4, 2], [6, 2], [8, 2], [10, 2], [12, 2],
                     [1, 4], [3, 4], [5, 4], [7, 4], [9, 4], [11, 4],
                     [2, 6], [4, 6], [6, 6], [8, 6], [10, 6],
                     [3, 8], [5, 8], [7, 8], [9, 8],
                     [4, 10], [6, 10], [8, 10],
                     [5, 12], [7, 12]], dtype=np.int64)
    mapto = np.zeros_like(base)
    mapto[:, 0] = base[:, 0] // 2
    mapto[:, 1] = base[:, 1] // 2
    mapto[:, 0] += (mapto[:, 1] + 1) % 2

    evencc = np.array([[4, 0], [6, 0], [10, 0], [2, 0], [8, 0],
                       [5, 2], [7, 2], [3, 2], [9, 2], [1, 2], [11, 2],
                       [2, 4], [8, 4], [10, 4], [6, 4], [4, 4],
                       [7, 6], [9, 6], [5, 6], [3, 6],
                       [4, 8], [6, 8], [8, 8],
                       [5, 10], [7, 10],
                       [6, 12]], dtype=np.int64)
    evencc_half = evencc // 2

    uneven = np.array([[5, 1], [6, 1], [7, 1], [3, 1], [0, 1], [4, 1], [9, 1],
                       [2, 1], [10, 1], [1, 1], [11, 1], [8, 1],
                       [6, 3], [3, 3], [7, 3], [4, 3], [8, 3], [2, 3], [9, 3],
                       [1, 3], [10, 3], [0, 3], [11, 3], [5, 3],
                       [6, 5], [4, 5], [10, 5], [1, 5], [9, 5], [5, 5], [2, 5],
                       [8, 5], [7, 5], [3, 5],
                       [4, 7], [6, 7], [9, 7], [5, 7], [8, 7], [3, 7], [7, 7],
                       [2, 7],
                       [6, 9], [5, 9], [7, 9], [8, 9], [3, 9], [4, 9],
                       [4, 11], [7, 11], [5, 11], [6, 11]], dtype=np.int64)

    G = np.zeros((N_IN, N_OUT), dtype=np.float32)
    base_map = {}  # (row, col) in output grid -> input flat index

    # 1) base vertices: direct copy from input[mapto].
    for (r, c), (mr, mc) in zip(base, mapto):
        r, c, mr, mc = int(r), int(c), int(mr), int(mc)
        idx_in = mr * W_IN + mc
        idx_out = r * W_OUT + c
        G[idx_in, idx_out] += 1.0
        base_map[(r, c)] = idx_in

    # 2) uneven-cc vertices: average of the 4 diagonal neighbors of the
    #    scattered grid.  At this point of the PyTorch forward only base
    #    vertices are nonzero, so only base neighbors contribute.
    for ii, jj in uneven:
        ii, jj = int(ii), int(jj)
        idx_out = ii * W_OUT + jj
        neighbors = [(ii, max(jj - 1, 0)),
                     (ii, min(jj + 1, W_OUT - 1)),
                     (min(ii + 1, H_OUT - 1), max(jj - 1, 0)),
                     (min(ii + 1, H_OUT - 1), min(jj + 1, W_OUT - 1))]
        for nb in neighbors:
            if nb in base_map:
                G[base_map[nb], idx_out] += 1.0

    # 3) even-cc vertices: average of two vertically adjacent input samples.
    for (r, c), (hr, hc) in zip(evencc, evencc_half):
        r, c, hr, hc = int(r), int(c), int(hr), int(hc)
        idx_out = r * W_OUT + c
        G[min(hr, H_IN - 1) * W_IN + hc, idx_out] += 1.0
        G[min(hr + 1, H_IN - 1) * W_IN + hc, idx_out] += 1.0

    return G


def _depool_kernel(x0_ref, x_ref, g_ref, o_ref):
    # x0_ref: (1, 49)  -- the (b=0, c=0) row, resident (constant index map)
    # x_ref : (TM, 49) -- current row tile
    # g_ref : (49, 169) static multiplicity matrix, resident
    # o_ref : (TM, 169)
    g = g_ref[...]

    # Nonzero-contributor count from the (b=0, c=0) row only, matching the
    # PyTorch `tmp[:, 0, 0] != 0` semantics.  Recomputed every grid step
    # (one 1x49x169 matmul + 169 exact divides -- negligible) so the grid axis
    # can stay "parallel" (megacore-safe; no pl.when(step==0) scratch init).
    nz = (x0_ref[...] != 0.0).astype(jnp.float32)                        # (1, 49)
    counts = jnp.dot(nz, g, preferred_element_type=jnp.float32)          # (1, 169)
    inv = 1.0 / jnp.maximum(counts, 1.0)                                 # exact

    # Steady-state work: one MXU matmul + broadcast multiply + store.
    # (Multiply-by-reciprocal replaces the previous per-element divide; kept
    # as a post-multiply rather than folded into G to match the reference's
    # sum-then-divide rounding -- the VPU multiply is free under HBM-bound.)
    sums = jnp.dot(x_ref[...], g, preferred_element_type=jnp.float32)    # (TM, 169)
    o_ref[...] = sums * inv


def _tile_rows_and_vmem_limit():
    """Generation-aware row-tile size and optional scoped-VMEM raise."""
    try:
        vmem_bytes = pltpu.get_tpu_info().vmem_capacity_bytes
    except Exception:
        vmem_bytes = 0
    if vmem_bytes >= (100 << 20):
        # v5e / v6e class (128 MiB physical VMEM): TM=4096 double-buffered is
        # ~12 MiB; raise the scoped limit so the 16 MiB v5e default is roomy.
        return 4096, 48 << 20
    # v7x class (64 MiB physical, shared by 2 TCs) or unknown: ~6 MiB at
    # TM=2048 stays well inside the 32 MiB default scoped limit.
    return 2048, None


def second_depooling(x: jax.Array) -> jax.Array:
    """x: (B, C, 7, 7) -> (B, C, 13, 13), float32."""
    B, C, H, W = x.shape
    assert (H, W) == (H_IN, W_IN)

    bc = B * C
    x_flat = x.reshape(bc, N_IN).astype(jnp.float32)

    # Sublane-align the row count.  Padding rows are zeros and are sliced off
    # below; rows are independent apart from the shared (b=0,c=0) denominator,
    # which is fed separately, so padding never pollutes real outputs.
    bc_pad = ((bc + 7) // 8) * 8
    if bc_pad != bc:
        x_flat = jnp.pad(x_flat, ((0, bc_pad - bc), (0, 0)))

    tm_max, vmem_limit = _tile_rows_and_vmem_limit()
    tm = min(tm_max, bc_pad)
    grid = (pl.cdiv(bc_pad, tm),)

    g = jnp.asarray(_build_gather_matrix())      # (49, 169) static weights
    x_row0 = x_flat[0:1, :]                      # (1, 49): the (b=0, c=0) row

    cost = pl.CostEstimate(
        flops=2 * bc_pad * N_IN * N_OUT,
        transcendentals=0,
        bytes_accessed=(bc_pad * (N_IN + N_OUT) + N_IN * N_OUT + N_IN) * 4,
    )

    out_flat = pl.pallas_call(
        _depool_kernel,
        out_shape=jax.ShapeDtypeStruct((bc_pad, N_OUT), jnp.float32),
        grid=grid,
        in_specs=[
            # Constant-index blocks stay resident in VMEM (no per-step re-DMA).
            pl.BlockSpec((1, N_IN), lambda i: (0, 0)),          # row 0
            pl.BlockSpec((tm, N_IN), lambda i: (i, 0)),         # row tile
            pl.BlockSpec((N_IN, N_OUT), lambda i: (0, 0)),      # G
        ],
        out_specs=pl.BlockSpec((tm, N_OUT), lambda i: (i, 0)),
        compiler_params=pltpu.CompilerParams(
            dimension_semantics=("parallel",),
            vmem_limit_bytes=vmem_limit,
        ),
        cost_estimate=cost,
    )(x_row0, x_flat, g)

    return out_flat[:bc].reshape(B, C, H_OUT, W_OUT)


if __name__ == "__main__":
    key = jax.random.PRNGKey(0)
    # Small shape consistent with the module: input spatial grid is 7x7.
    x = jax.random.normal(key, (2, 4, H_IN, W_IN), dtype=jnp.float32)

    out = second_depooling(x)
    out = jax.block_until_ready(out)

    assert out.shape == (2, 4, H_OUT, W_OUT)
    assert out.dtype == jnp.float32
    print("KERNEL_OK")
</pallas_src>

<mosaic_0001>
module attributes {stable_mosaic.version = 11 : i64} {
  func.func @_depool_kernel(%arg0: i32, %arg1: memref<1x49xf32, #tpu.memory_space<vmem>>, %arg2: memref<8x49xf32, #tpu.memory_space<vmem>>, %arg3: memref<49x169xf32, #tpu.memory_space<vmem>>, %arg4: memref<8x169xf32, #tpu.memory_space<vmem>>) attributes {dimension_semantics = [#tpu.dimension_semantics<parallel>], iteration_bounds = array<i64: 1>, scalar_prefetch = 0 : i64, scratch_operands = 0 : i64, tpu.core_type = #tpu.core_type<tc>, window_params = [{pipeline_mode = #tpu.pipeline_mode<synchronous>, transform_indices = @transform_0, window_bounds = array<i64: 1, 49>}, {transform_indices = @transform_1, window_bounds = array<i64: 8, 49>}, {pipeline_mode = #tpu.pipeline_mode<synchronous>, transform_indices = @transform_2, window_bounds = array<i64: 49, 169>}, {transform_indices = @transform_3, window_bounds = array<i64: 8, 169>}]} {
    %c0 = arith.constant 0 : index
    %c0_0 = arith.constant 0 : index
    %0 = vector.load %arg3[%c0, %c0_0] : memref<49x169xf32, #tpu.memory_space<vmem>>, vector<49x169xf32>
    %c0_1 = arith.constant 0 : index
    %c0_2 = arith.constant 0 : index
    %1 = vector.load %arg1[%c0_1, %c0_2] : memref<1x49xf32, #tpu.memory_space<vmem>>, vector<1x49xf32>
    %cst = arith.constant 0.000000e+00 : f32
    %2 = vector.broadcast %cst : f32 to vector<1x49xf32>
    %3 = arith.cmpf one, %1, %2 : vector<1x49xf32>
    %4 = arith.extui %3 : vector<1x49xi1> to vector<1x49xi32>
    %5 = arith.sitofp %4 : vector<1x49xi32> to vector<1x49xf32>
    %cst_3 = arith.constant dense<0.000000e+00> : vector<1x169xf32>
    %6 = tpu.matmul %5, %0, %cst_3 {dimension_numbers = #tpu.dot_dimension_numbers<[1], [0], [0], [1], [0, 0, 1, 1], [], []>} : vector<1x49xf32>, vector<49x169xf32>, vector<1x169xf32> -> vector<1x169xf32>
    %cst_4 = arith.constant 1.000000e+00 : f32
    %7 = vector.broadcast %cst_4 : f32 to vector<1x169xf32>
    %8 = arith.maximumf %6, %7 : vector<1x169xf32>
    %cst_5 = arith.constant 1.000000e+00 : f32
    %9 = vector.broadcast %cst_5 : f32 to vector<1x169xf32>
    %10 = arith.divf %9, %8 : vector<1x169xf32>
    %c0_6 = arith.constant 0 : index
    %c0_7 = arith.constant 0 : index
    %11 = vector.load %arg2[%c0_6, %c0_7] : memref<8x49xf32, #tpu.memory_space<vmem>>, vector<8x49xf32>
    %cst_8 = arith.constant dense<0.000000e+00> : vector<8x169xf32>
    %12 = tpu.matmul %11, %0, %cst_8 {dimension_numbers = #tpu.dot_dimension_numbers<[1], [0], [0], [1], [0, 0, 1, 1], [], []>} : vector<8x49xf32>, vector<49x169xf32>, vector<8x169xf32> -> vector<8x169xf32>
    %13 = vector.broadcast %10 : vector<1x169xf32> to vector<8x169xf32>
    %14 = arith.mulf %12, %13 : vector<8x169xf32>
    %c0_9 = arith.constant 0 : index
    %c0_10 = arith.constant 0 : index
    %15 = vector.load %arg4[%c0_9, %c0_10] : memref<8x169xf32, #tpu.memory_space<vmem>>, vector<8x169xf32>
    tpu.vector_store %arg4[%c0_9, %c0_10], %14 {strides = array<i32>} : memref<8x169xf32, #tpu.memory_space<vmem>>, vector<8x169xf32>,
    return
  }
  func.func @transform_0(%arg0: i32) -> (i32, i32) {
    %c0_i32 = arith.constant 0 : i32
    %c0_i32_0 = arith.constant 0 : i32
    %c0_i32_1 = arith.constant 0 : i32
    return %c0_i32, %c0_i32_0 : i32, i32
  }
  func.func @transform_1(%arg0: i32) -> (i32, i32) {
    %c0_i32 = arith.constant 0 : i32
    %c0_i32_0 = arith.constant 0 : i32
    return %arg0, %c0_i32 : i32, i32
  }
  func.func @transform_2(%arg0: i32) -> (i32, i32) {
    %c0_i32 = arith.constant 0 : i32
    %c0_i32_0 = arith.constant 0 : i32
    %c0_i32_1 = arith.constant 0 : i32
    return %c0_i32, %c0_i32_0 : i32, i32
  }
  func.func @transform_3(%arg0: i32) -> (i32, i32) {
    %c0_i32 = arith.constant 0 : i32
    %c0_i32_0 = arith.constant 0 : i32
    return %arg0, %c0_i32 : i32, i32
  }
}

</mosaic_0001>

<bundles_post_ra>
// kernel: tpu_custom_call.1
= control target key start
LH: loop header
LB: loop body
LE: loop exit
PB: predicated region body
PF: predicated region fallthrough
CT: control target
= control target key end

     0   :  { %8 = vsyncpa [#allocation3], 0  ;;  %s405_s0 = inlined_call_operand.hbm [shape: f32[1,49], index: 0, kind: input, shape index: {}]   ;;  %s406_s1 = inlined_call_operand.hbm [shape: f32[8,49], index: 1, kind: input, shape index: {}]   ;;  %s407_s2 = inlined_call_operand.hbm [shape: f32[49,169], index: 2, kind: input, shape index: {}]   ;;  %s408_s3 = inlined_call_operand.hbm [shape: f32[8,169], index: 3, kind: output, shape index: {}]  }
   0x1   :  { %9 = vsyncpa [#allocation6], 0 }
   0x2   :  { %10 = vsyncpa [#allocation4], 0  ;;  %s366_s12 = smov [#allocation5]   ;;  %s367_s14 = smov [#allocation2]  }
   0x3   :  { %s27_s13 = sshll.u32 %s366_s12, 4  ;;  %s17_s15 = sshll.u32 %s367_s14, 4  ;;  %s28_s13 = int_to_ptr.vmem [resolvable:$true] %s27_s13  ;;  %s18_s15 = int_to_ptr.vmem [resolvable:$true] %s17_s15 }
   0x4   :  { %s288_s16 = scalar_lea.vmem %s28_s13, 128  ;;  %p293_p1 = scmp.lt.s32.totalorder %s28_s13, %s28_s13 }
   0x5   :  { %p289_p0 = scmp.ne.s32.totalorder %s28_s13, %s288_s16  ;;  %p294_p2 = scmp.lt.s32.totalorder %s288_s16, %s288_s16 }
   0x7   :  { %p295_p3 = por %p294_p2, %p293_p1 }
   0x9   :  { %p296_p4 = pnand %p295_p3, %p289_p0 }
   0xb   :  { %299 = shalt.err (!%p296_p4)
}
   0xc   :  { %30 = dma.hbm_to_vmem [thread:$0]  %s406_s1, 128, %s28_s13, [#allocation6]  }
   0xd   :  { %s308_s19 = scalar_lea.vmem %s18_s15, 16  ;;  %s312_s20 = scalar_lea.vmem %s18_s15, 32 }
   0xe   :  { %p309_p5 = scmp.ne.s32.totalorder %s18_s15, %s308_s19  ;;  %p313_p6 = scmp.lt.s32.totalorder %s18_s15, %s18_s15 }
   0xf   :  { %p314_p7 = scmp.lt.s32.totalorder %s312_s20, %s308_s19 }
  0x11   :  { %p315_p8 = por %p314_p7, %p313_p6 }
  0x13   :  { %p316_p9 = pnand %p315_p8, %p309_p5 }
  0x15   :  { %319 = shalt.err (!%p316_p9)
}
  0x16   :  { %20 = dma.hbm_to_vmem [thread:$0]  %s405_s0, 16, %s18_s15, [#allocation3]  }
  0x17   :  { %s368_s23 = smov [#allocation7]  }
  0x18   :  { %s36_s24 = sshll.u32 %s368_s23, 4  ;;  %s37_s24 = int_to_ptr.vmem [resolvable:$true] %s36_s24 }
  0x19   :  { %s328_s25 = scalar_lea.vmem %s37_s24, 1792  ;;  %p333_p11 = scmp.lt.s32.totalorder %s37_s24, %s37_s24 }
  0x1a   :  { %p329_p10 = scmp.ne.s32.totalorder %s37_s24, %s328_s25  ;;  %p334_p12 = scmp.lt.s32.totalorder %s328_s25, %s328_s25 }
  0x1c   :  { %p335_p13 = por %p334_p12, %p333_p11 }
  0x1e   :  { %p336_p0 = pnand %p335_p13, %p329_p10 }
  0x20   :  { %339 = shalt.err (!%p336_p0)
}
  0x21   :  { %s369_s1 = smov 256   ;;  %s370_s26 = smov 16  }
  0x22   :  { %42 = dma.hbm_to_vmem [thread:$0]  %s407_s2, 1792, %s37_s24, [#allocation6], %s369_s1, %s369_s1, %s370_s26  }
  0x23   :  { %360 = dma.done.wait [#allocation3], 16  }
  0x24   :  { %361 = vsyncadd [#allocation3], 4294967280 }
  0x25   :  { %362 = dma.done.wait [#allocation6], 1920  }
  0x26   :  { %363 = vsyncadd [#allocation6], 4294965376  ;;  %v371_v0 = vmov 0.0   ;;  %vm74_vm0 = vcmask 1040384   ;;  %v65_v1 = vld [vmem:[#allocation7 + $0x68] sm:$0x1]  ;;  %v233_v22 = vlaneseq }
  0x27   :  { %145 = vmatprep.mubr.f32.mxu0 %v371_v0  ;;  %226 = vmatprep.mubr.f32.mxu1 %v371_v0  ;;  %v64_v2 = vld [vmem:[#allocation7 + $0x60] sm:$0x1]  ;;  %v63_v3 = vld [vmem:[#allocation7 + $0x58] sm:$0xff]  ;;  %v62_v4 = vld [vmem:[#allocation7 + $0x50] sm:$0xff]  ;;  %vm70_vm2 = vcmask 400384   ;;  %s372_s0 = smov [#allocation8]  }
  0x28   :  { %263 = vmatprep.subr.msk.mxu0 %vm74_vm0, %v65_v1  ;;  %266 = vmatprep.subr.msk.mxu1 %vm74_vm0, %v65_v1  ;;  %v61_v5 = vld [vmem:[#allocation7 + $0x48] sm:$0xff]  ;;  %v60_v6 = vld [vmem:[#allocation7 + $0x40] sm:$0xff]  ;;  %v59_v7 = vld [vmem:[#allocation7 + $0x38] sm:$0xff]  ;;  %v234_v23 = vshrl.u32 %v233_v22, 7  ;;  %s252_s2 = sshll.u32 %s372_s0, 4  ;;  %vm244_vm3 = vcmask 334848   ;;  %s253_s2 = int_to_ptr.vmem [resolvable:$true] %s252_s2 }
  0x29   :  { %264 = vmatpush1.msk.msra.mxu0 %vm74_vm0, %v64_v2  ;;  %267 = vmatpush1.msk.msra.mxu1 %vm74_vm0, %v64_v2  ;;  %v58_v8 = vld [vmem:[#allocation7 + $0x30] sm:$0xff]  ;;  %v57_v9 = vld [vmem:[#allocation7 + $0x28] sm:$0xff]  ;;  %v56_v11 = vld [vmem:[#allocation7 + $0x20] sm:$0xff]  ;;  %s340_s29 = scalar_lea.vmem %s253_s2, 256  ;;  %p345_p2 = scmp.lt.s32.totalorder %s253_s2, %s253_s2 }
  0x2a   :  { %101 = vmatprep.subr.mxu0 %v63_v3  ;;  %182 = vmatprep.subr.mxu1 %v63_v3  ;;  %v66_v10 = vld [vmem:[#allocation2] sm:$0x1]  ;;  %v55_v12 = vld [vmem:[#allocation7 + $0x18] sm:$0xff]  ;;  %v53_v14 = vld [vmem:[#allocation7 + $0x8] sm:$0xff]  ;;  %v235_v24 = vsub.s32 0, %v234_v23  ;;  %p341_p1 = scmp.ne.s32.totalorder %s253_s2, %s340_s29  ;;  %p346_p3 = scmp.lt.s32.totalorder %s340_s29, %s340_s29 }
  0x2b   :  { %102 = vmatpush1.msra.mxu0 %v62_v4  ;;  %183 = vmatpush1.msra.mxu1 %v62_v4  ;;  %v54_v13 = vld [vmem:[#allocation7 + $0x10] sm:$0xff]  ;;  %vm67_vm1 = vcmp.ne.f32.partialorder %v66_v10, 0.0  ;;  %v52_v15 = vld [vmem:[#allocation7] sm:$0xff]  ;;  %v158_v17 = vld [vmem:[#allocation5] sm:$0xff] }
  0x2c   :  { %103 = vmatprep.subr.mxu0 %v61_v5  ;;  %184 = vmatprep.subr.mxu1 %v61_v5  ;;  %v262_v16 = vsel %vm67_vm1, 1.0, %v371_v0  ;;  %p347_p4 = por %p346_p3, %p345_p2 }
  0x2d   :  { %104 = vmatpush1.msra.mxu0 %v60_v6  ;;  %185 = vmatpush1.msra.mxu1 %v60_v6 }
  0x2e   :  { %105 = vmatprep.subr.mxu0 %v59_v7  ;;  %186 = vmatprep.subr.mxu1 %v59_v7  ;;  %p348_p5 = pnand %p347_p4, %p341_p1 }
  0x2f   :  { %106 = vmatpush1.msra.mxu0 %v58_v8  ;;  %187 = vmatpush1.msra.mxu1 %v58_v8 }
  0x30   :  { %107 = vmatprep.subr.mxu0 %v57_v9  ;;  %188 = vmatprep.subr.mxu1 %v57_v9 }
  0x31   :  { %108 = vmatpush1.msra.mxu0 %v56_v11  ;;  %189 = vmatpush1.msra.mxu1 %v56_v11 }
  0x32   :  { %109 = vmatprep.subr.mxu0 %v55_v12  ;;  %190 = vmatprep.subr.mxu1 %v55_v12 }
  0x33   :  { %110 = vmatpush1.msra.mxu0 %v54_v13  ;;  %191 = vmatpush1.msra.mxu1 %v54_v13 }
  0x34   :  { %111 = vmatprep.subr.mxu0 %v53_v14  ;;  %192 = vmatprep.subr.mxu1 %v53_v14 }
  0x35   :  { %112 = vmatpush1.msra.mxu0 %v52_v15  ;;  %193 = vmatpush1.msra.mxu1 %v52_v15 }
  0x36   :  { %265 = vmatmul.mubr.msk.f32.vlgmr.msra.gmra.mxu0 %vm70_vm2, %v262_v16  ;;  %268 = vmatmul.mubr.msk.f32.vlgmr.msra.gmra.mxu1 %vm70_vm2, %v158_v17 }
  0xf6   :  { %v147_v18 = vpop.f32.mrf.mxu0  ;;  %v228_v26 = vpop.f32.mrf.mxu1 }
  0xf7   :  { %v152_v19 = vmax.f32 %v147_v18, 1.0 }
  0xf8   :  { %v149_v20 = vpop.f32.mrf.mxu0  ;;  %v230_v31 = vpop.f32.mrf.mxu1 }
  0xf9   :  { %276 = vrcp.f32 %v152_v19  ;;  %v153_v21 = vmax.f32 %v149_v20, 1.0 }
  0xfb   :  { %278 = vrcp.f32 %v153_v21 }
 0x106   :  { %v277_v25 = vpop.eup %276 }
 0x107   :  { %v236_v27 = vrot.slane %v277_v25, %v235_v24 }
 0x108   :  { %v279_v28 = vpop.eup %278 }
 0x109   :  { %v241_v29 = vmul.f32 %v236_v27, %v228_v26  ;;  %v240_v30 = vrot.slane %v279_v28, %v235_v24 }
 0x10b   :  { %243 = vst [vmem:[#allocation8] sm:$0xff] %v241_v29  ;;  %v242_v32 = vmul.f32 %v240_v30, %v230_v31 }
 0x10d   :  { %245 = vst.msk [vmem:[#allocation8 + $0x8] sm:$0xff] %vm244_vm3, %v242_v32 }
 0x10e   :  { %351 = shalt.err (!%p348_p5)
}
 0x10f   :  { %255 = dma.vmem_to_hbm [thread:$0]  %s253_s2, 256, %s408_s3, [#allocation4]  }
 0x110   :  { %364 = dma.done.wait [#allocation4], 256  }
 0x111   :  { %365 = vsyncadd [#allocation4], 4294967040 }
 0x112   :  { %259 = vsyncpa [#allocation3], 1 }
 0x113   :  { %260 = vsyncpa [#allocation6], 1 }
 0x114   :  { %261 = vsyncpa [#allocation4], 1 }

</bundles_post_ra>
